<compile_context>
chip_gen: v5e
topology: v5e:2x2
jax: 0.10.0
libtpu: 0.0.40
codegen_flags: <defaults>
</compile_context>

<pallas_src>
import jax
import jax.numpy as jnp
from jax.experimental import pallas as pl
from jax.experimental.pallas import tpu as pltpu


def _h_swish_kernel(x_ref, o_ref):
    x = x_ref[...]
    # h_sigmoid(x) = ReLU6(x + 3) / 6 ; h_swish(x) = x * h_sigmoid(x)
    # Weak-typed constants keep bf16 inputs in bf16 (matches PyTorch half behavior).
    hs = jnp.clip(x + 3.0, 0.0, 6.0) * (1.0 / 6.0)
    o_ref[...] = (x * hs).astype(o_ref.dtype)


def h_swish(x: jax.Array, *, target_block_bytes: int = 2 * 1024 * 1024) -> jax.Array:
    """Elementwise h_swish on an arbitrary-shape array (NCHW expected)."""
    orig_shape = x.shape
    dtype = x.dtype
    n = x.size
    if n == 0:
        return x

    itemsize = jnp.dtype(dtype).itemsize
    # Sublane packing factor: 8 rows (f32), 16 (bf16/f16), 32 (int8/fp8).
    sub = 8 * max(1, 4 // itemsize)

    x_flat = x.reshape(-1)

    # Pick the widest lane count that divides n exactly -> zero-copy reshape.
    lanes = None
    for cand in (1024, 512, 256, 128):
        if n % cand == 0:
            lanes = cand
            break

    pad = 0
    if lanes is None:
        # Rare ragged case (n not a multiple of 128): pad the flat tail to the
        # next multiple of 128 lanes only; the row-block masking handles rows.
        lanes = 128
        total = -(-n // lanes) * lanes
        pad = total - n
        x_flat = jnp.pad(x_flat, (0, pad))

    rows = (n + pad) // lanes
    x2d = x_flat.reshape(rows, lanes)

    # Row tile sized for ~target_block_bytes per block, aligned to sublane packing.
    tr = (target_block_bytes // (lanes * itemsize)) // sub * sub
    tr = max(sub, tr)
    if tr >= rows:
        tr = rows                     # single full-extent block (always legal)
        grid = (1,)
    else:
        grid = (pl.cdiv(rows, tr),)   # partial last block handled by Pallas masking

    out2d = pl.pallas_call(
        _h_swish_kernel,
        out_shape=jax.ShapeDtypeStruct((rows, lanes), dtype),
        grid_spec=pltpu.PrefetchScalarGridSpec(
            num_scalar_prefetch=0,
            grid=grid,
            in_specs=[pl.BlockSpec((tr, lanes), lambda i: (i, 0))],
            out_specs=pl.BlockSpec((tr, lanes), lambda i: (i, 0)),
        ),
        compiler_params=pltpu.CompilerParams(
            dimension_semantics=("parallel",),     # lets v7x shard across its 2 TCs
            vmem_limit_bytes=32 * 1024 * 1024,     # headroom over v5e's 16 MiB default
        ),
        cost_estimate=pl.CostEstimate(
            flops=4 * n,
            transcendentals=0,
            bytes_accessed=2 * n * itemsize,
        ),
    )(x2d)

    out_flat = out2d.reshape(-1)
    if pad:
        out_flat = out_flat[:n]
    return out_flat.reshape(orig_shape)


def h_swish_ref(x: jax.Array) -> jax.Array:
    return x * (jnp.clip(x + 3.0, 0.0, 6.0) / 6.0)


if __name__ == "__main__":
    key = jax.random.PRNGKey(0)

    # Primary test: NCHW input, small shape (n divisible by 1024 -> zero-copy path).
    x = jax.random.normal(key, (2, 4, 16, 16), dtype=jnp.float32) * 4.0
    out = jax.block_until_ready(h_swish(x))
    ref = h_swish_ref(x)
    assert out.shape == x.shape and out.dtype == x.dtype
    assert jnp.allclose(out, ref, atol=1e-6, rtol=1e-6), "mismatch vs reference (aligned)"

    # Ragged shape: exercises the rare pad-tail fallback (n % 128 != 0).
    x_odd = jax.random.normal(jax.random.PRNGKey(1), (2, 3, 15, 13), dtype=jnp.float32) * 4.0
    out_odd = jax.block_until_ready(h_swish(x_odd))
    assert jnp.allclose(out_odd, h_swish_ref(x_odd), atol=1e-6, rtol=1e-6), "mismatch (ragged)"

    # Medium shape: exercises the multi-step grid with a partial last block.
    x_med = jax.random.normal(jax.random.PRNGKey(2), (4, 32, 80, 80), dtype=jnp.float32) * 4.0
    out_med = jax.block_until_ready(h_swish(x_med))
    assert jnp.allclose(out_med, h_swish_ref(x_med), atol=1e-6, rtol=1e-6), "mismatch (tiled)"

    # bf16 path: exercises 16-row sublane packing and half-precision constants.
    x_bf = (jax.random.normal(jax.random.PRNGKey(3), (2, 8, 16, 16)) * 4.0).astype(jnp.bfloat16)
    out_bf = jax.block_until_ready(h_swish(x_bf))
    assert out_bf.dtype == jnp.bfloat16
    assert jnp.allclose(out_bf.astype(jnp.float32),
                        h_swish_ref(x_bf).astype(jnp.float32),
                        atol=2e-2, rtol=2e-2), "mismatch (bf16)"

    print("KERNEL_OK")
</pallas_src>

<mosaic_0001>
module attributes {stable_mosaic.version = 11 : i64} {
  func.func @_h_swish_kernel(%arg0: i32, %arg1: memref<2x1024xf32, #tpu.memory_space<vmem>>, %arg2: memref<2x1024xf32, #tpu.memory_space<vmem>>) attributes {dimension_semantics = [#tpu.dimension_semantics<parallel>], iteration_bounds = array<i64: 1>, scalar_prefetch = 0 : i64, scratch_operands = 0 : i64, tpu.core_type = #tpu.core_type<tc>, window_params = [{transform_indices = @transform_0, window_bounds = array<i64: 2, 1024>}, {transform_indices = @transform_1, window_bounds = array<i64: 2, 1024>}]} {
    %c0 = arith.constant 0 : index
    %c0_0 = arith.constant 0 : index
    %0 = vector.load %arg1[%c0, %c0_0] : memref<2x1024xf32, #tpu.memory_space<vmem>>, vector<2x1024xf32>
    %cst = arith.constant 3.000000e+00 : f32
    %1 = vector.broadcast %cst : f32 to vector<2x1024xf32>
    %2 = arith.addf %0, %1 : vector<2x1024xf32>
    %cst_1 = arith.constant 0.000000e+00 : f32
    %cst_2 = arith.constant 6.000000e+00 : f32
    %3 = vector.broadcast %cst_1 : f32 to vector<2x1024xf32>
    %4 = arith.maximumf %3, %2 : vector<2x1024xf32>
    %5 = vector.broadcast %cst_2 : f32 to vector<2x1024xf32>
    %6 = arith.minimumf %5, %4 : vector<2x1024xf32>
    %cst_3 = arith.constant 0.166666672 : f32
    %7 = vector.broadcast %cst_3 : f32 to vector<2x1024xf32>
    %8 = arith.mulf %6, %7 : vector<2x1024xf32>
    %9 = arith.mulf %0, %8 : vector<2x1024xf32>
    %c0_4 = arith.constant 0 : index
    %c0_5 = arith.constant 0 : index
    %10 = vector.load %arg2[%c0_4, %c0_5] : memref<2x1024xf32, #tpu.memory_space<vmem>>, vector<2x1024xf32>
    tpu.vector_store %arg2[%c0_4, %c0_5], %9 {strides = array<i32>} : memref<2x1024xf32, #tpu.memory_space<vmem>>, vector<2x1024xf32>,
    return
  }
  func.func @transform_0(%arg0: i32) -> (i32, i32) {
    %c0_i32 = arith.constant 0 : i32
    %c0_i32_0 = arith.constant 0 : i32
    return %arg0, %c0_i32 : i32, i32
  }
  func.func @transform_1(%arg0: i32) -> (i32, i32) {
    %c0_i32 = arith.constant 0 : i32
    %c0_i32_0 = arith.constant 0 : i32
    return %arg0, %c0_i32 : i32, i32
  }
}

</mosaic_0001>

<bundles_post_ra>
// kernel: tpu_custom_call.1
= control target key start
LH: loop header
LB: loop body
LE: loop exit
PB: predicated region body
PF: predicated region fallthrough
CT: control target
= control target key end

     0   :  { %6 = vsyncpa [#allocation3], 0  ;;  %s126_s0 = inlined_call_operand.hbm [shape: f32[2,1024], index: 0, kind: input, shape index: {}]   ;;  %s127_s1 = inlined_call_operand.hbm [shape: f32[2,1024], index: 1, kind: output, shape index: {}]  }
   0x1   :  { %7 = vsyncpa [#allocation4], 0  ;;  %s13_s8 = sshll.u32 %s126_s0, 4  ;;  %s108_s9 = smov [#allocation2]   ;;  %s14_s8 = int_to_ptr.hbm [resolvable:$true] %s13_s8 }
   0x2   :  { %s15_s10 = sshll.u32 %s108_s9, 4  ;;  %s16_s10 = int_to_ptr.vmem [resolvable:$true] %s15_s10 }
   0x3   :  { %18 = dma.hbm_to_vmem [thread:$0]  %s14_s8, 256, %s16_s10, [#allocation3]  }
   0x4   :  { %104 = dma.done.wait [#allocation3], 256  }
   0x5   :  { %105 = vsyncadd [#allocation3], 4294967040  ;;  %v23_v0 = vld [vmem:[#allocation2] sm:$0xff]  ;;  %v24_v1 = vld [vmem:[#allocation2 + $0x8] sm:$0xff]  ;;  %s109_s11 = smov [#allocation5]   ;;  %s44_s14 = sshll.u32 %s127_s1, 4  ;;  %s45_s14 = int_to_ptr.hbm [resolvable:$true] %s44_s14 }
   0x6   :  { %v25_v2 = vadd.f32 3.0, %v23_v0  ;;  %v26_v3 = vadd.f32 3.0, %v24_v1  ;;  %s42_s12 = sshll.u32 %s109_s11, 4  ;;  %s43_s12 = int_to_ptr.vmem [resolvable:$true] %s42_s12 }
   0x8   :  { %v27_v4 = vmax.f32 %v25_v2, 0.0  ;;  %v28_v5 = vmax.f32 %v26_v3, 0.0 }
   0xa   :  { %v29_v6 = vmin.f32 %v27_v4, 6.0  ;;  %v30_v7 = vmin.f32 %v28_v5, 6.0 }
   0xc   :  { %v31_v8 = vmul.f32 0.16666667, %v29_v6  ;;  %v32_v9 = vmul.f32 0.16666667, %v30_v7 }
   0xe   :  { %v33_v10 = vmul.f32 %v31_v8, %v23_v0  ;;  %v34_v11 = vmul.f32 %v32_v9, %v24_v1 }
  0x10   :  { %35 = vst [vmem:[#allocation5] sm:$0xff] %v33_v10 }
  0x11   :  { %36 = vst [vmem:[#allocation5 + $0x8] sm:$0xff] %v34_v11 }
  0x12   :  { %47 = dma.vmem_to_hbm [thread:$0]  %s43_s12, 256, %s45_s14, [#allocation4]  }
  0x13   :  { %106 = dma.done.wait [#allocation4], 256  }
  0x14   :  { %107 = vsyncadd [#allocation4], 4294967040 }
  0x15   :  { %52 = vsyncpa [#allocation3], 1 }
  0x16   :  { %53 = vsyncpa [#allocation4], 1 }

</bundles_post_ra>
